<compile_context>
chip_gen: v7x
topology: tpu7x:2x2x1
jax: 0.10.0
libtpu: 0.0.40
codegen_flags: <defaults>
</compile_context>

<pallas_src>
import jax
import jax.numpy as jnp
from jax.experimental import pallas as pl
from jax.experimental.pallas import tpu as pltpu


def _ddpm_blend_kernel(sa_ref, sb_ref, x_ref, eps_ref, out_ref):
    # sa_ref, sb_ref: VMEM (B_TILE, 1) f32 broadcast scales
    # x_ref, eps_ref, out_ref: VMEM (B_TILE, L_TILE) tiles
    out_ref[...] = (
        sa_ref[...] * x_ref[...] + sb_ref[...] * eps_ref[...]
    ).astype(out_ref.dtype)


def _round_up(x, m):
    return ((x + m - 1) // m) * m


def _choose_lane_tile(l_pad, max_lanes=32768):
    """Largest multiple of 128 that divides l_pad and is <= max_lanes."""
    m = l_pad // 128
    best = 1
    for d in range(1, min(m, max_lanes // 128) + 1):
        if m % d == 0:
            best = d
    return 128 * best


class DDPM:
    """JAX/Pallas port of the PyTorch DDPM forward (noising) pass."""

    def __init__(self, n_steps=1000, min_beta=1e-4, max_beta=0.02):
        self.n_steps = n_steps
        self.betas = jnp.linspace(min_beta, max_beta, n_steps, dtype=jnp.float32)
        self.alphas = 1.0 - self.betas
        self.alphas_bar = jnp.cumprod(self.alphas, axis=0)

    def forward(self, x0, t, epsilon):
        # x0, epsilon: (N, C, H, W) ; t: (N,) int32
        n, c, h, w = x0.shape
        l = c * h * w
        dtype = x0.dtype

        # Schedule gather + sqrt done once in the wrapper (tiny, keeps the
        # kernel body a pure FMA).
        abar_t = self.alphas_bar[t].astype(jnp.float32)          # (N,)
        sqrt_ab = jnp.sqrt(abar_t)
        sqrt_1m = jnp.sqrt(1.0 - abar_t)

        # Flatten spatial+channel dims so the last dim is lane-dense.
        x_flat = x0.reshape(n, l)
        eps_flat = epsilon.reshape(n, l)

        # Tile selection: lane tile is a multiple of 128 dividing the padded
        # length, capped so one input tile stays ~<=1 MiB (B_TILE=8 rows).
        l_pad = _round_up(l, 128)
        if n <= 8:
            b_tile, n_pad = n, n
        else:
            b_tile, n_pad = 8, _round_up(n, 8)
        l_tile = _choose_lane_tile(l_pad)
        # Give the megacore (v7x) at least 2 parallel grid steps when it does
        # not shrink tiles below 128 lanes.
        if ((n_pad // b_tile) * (l_pad // l_tile) < 2
                and l_tile >= 256 and (l_tile // 2) % 128 == 0):
            l_tile //= 2

        if n_pad != n or l_pad != l:
            x_flat = jnp.pad(x_flat, ((0, n_pad - n), (0, l_pad - l)))
            eps_flat = jnp.pad(eps_flat, ((0, n_pad - n), (0, l_pad - l)))
            sqrt_ab = jnp.pad(sqrt_ab, (0, n_pad - n))
            sqrt_1m = jnp.pad(sqrt_1m, (0, n_pad - n))

        sa = sqrt_ab.reshape(n_pad, 1)
        sb = sqrt_1m.reshape(n_pad, 1)

        grid = (n_pad // b_tile, l_pad // l_tile)
        itemsize = jnp.dtype(dtype).itemsize

        out_flat = pl.pallas_call(
            _ddpm_blend_kernel,
            out_shape=jax.ShapeDtypeStruct((n_pad, l_pad), dtype),
            grid_spec=pltpu.PrefetchScalarGridSpec(
                num_scalar_prefetch=0,
                grid=grid,
                in_specs=[
                    pl.BlockSpec((b_tile, 1), lambda b, li: (b, 0)),       # sqrt(abar)
                    pl.BlockSpec((b_tile, 1), lambda b, li: (b, 0)),       # sqrt(1-abar)
                    pl.BlockSpec((b_tile, l_tile), lambda b, li: (b, li)),  # x0
                    pl.BlockSpec((b_tile, l_tile), lambda b, li: (b, li)),  # eps
                ],
                out_specs=pl.BlockSpec((b_tile, l_tile), lambda b, li: (b, li)),
            ),
            compiler_params=pltpu.CompilerParams(
                dimension_semantics=("parallel", "parallel"),
                vmem_limit_bytes=32 * 1024 * 1024,
            ),
            cost_estimate=pl.CostEstimate(
                flops=3 * n_pad * l_pad,
                transcendentals=0,
                bytes_accessed=3 * n_pad * l_pad * itemsize,
            ),
        )(sa, sb, x_flat, eps_flat)

        if n_pad != n or l_pad != l:
            out_flat = out_flat[:n, :l]
        return out_flat.reshape(n, c, h, w)

    def __call__(self, x0, t, epsilon=None, key=None):
        if epsilon is None:
            if key is None:
                key = jax.random.PRNGKey(0)
            epsilon = jax.random.normal(key, x0.shape, dtype=x0.dtype)
        return self.forward(x0, t, epsilon)

    # TODO(synk): backward()/generate_gif() require the external denoising
    # network `self.network`, which is not part of this module's forward pass.


if __name__ == "__main__":
    key = jax.random.PRNGKey(0)
    k_x, k_eps, k_t = jax.random.split(key, 3)

    N, C, H, W = 2, 4, 16, 16
    x0 = jax.random.normal(k_x, (N, C, H, W), dtype=jnp.float32)
    epsilon = jax.random.normal(k_eps, (N, C, H, W), dtype=jnp.float32)
    t = jax.random.randint(k_t, (N,), 0, 1000, dtype=jnp.int32)

    model = DDPM(n_steps=1000, min_beta=1e-4, max_beta=0.02)
    out = model(x0, t, epsilon)
    out = jax.block_until_ready(out)

    # correctness check against plain-JAX reference
    abar = model.alphas_bar[t]
    ref = (jnp.sqrt(abar).reshape(N, 1, 1, 1) * x0
           + jnp.sqrt(1.0 - abar).reshape(N, 1, 1, 1) * epsilon)
    assert out.shape == (N, C, H, W)
    assert jnp.allclose(out, ref, atol=1e-5, rtol=1e-5)

    print("KERNEL_OK")
</pallas_src>

<mosaic_0001>
module attributes {stable_mosaic.version = 11 : i64} {
  func.func @_ddpm_blend_kernel(%arg0: i32, %arg1: i32, %arg2: memref<2x1xf32, #tpu.memory_space<vmem>>, %arg3: memref<2x1xf32, #tpu.memory_space<vmem>>, %arg4: memref<2x512xf32, #tpu.memory_space<vmem>>, %arg5: memref<2x512xf32, #tpu.memory_space<vmem>>, %arg6: memref<2x512xf32, #tpu.memory_space<vmem>>) attributes {dimension_semantics = [#tpu.dimension_semantics<parallel>, #tpu.dimension_semantics<parallel>], iteration_bounds = array<i64: 1, 2>, scalar_prefetch = 0 : i64, scratch_operands = 0 : i64, tpu.core_type = #tpu.core_type<tc>, window_params = [{transform_indices = @transform_0, window_bounds = array<i64: 2, 1>}, {transform_indices = @transform_1, window_bounds = array<i64: 2, 1>}, {transform_indices = @transform_2, window_bounds = array<i64: 2, 512>}, {transform_indices = @transform_3, window_bounds = array<i64: 2, 512>}, {transform_indices = @transform_4, window_bounds = array<i64: 2, 512>}]} {
    %c0 = arith.constant 0 : index
    %c0_0 = arith.constant 0 : index
    %0 = vector.load %arg2[%c0, %c0_0] : memref<2x1xf32, #tpu.memory_space<vmem>>, vector<2x1xf32>
    %c0_1 = arith.constant 0 : index
    %c0_2 = arith.constant 0 : index
    %1 = vector.load %arg4[%c0_1, %c0_2] : memref<2x512xf32, #tpu.memory_space<vmem>>, vector<2x512xf32>
    %2 = vector.broadcast %0 : vector<2x1xf32> to vector<2x512xf32>
    %3 = arith.mulf %2, %1 : vector<2x512xf32>
    %c0_3 = arith.constant 0 : index
    %c0_4 = arith.constant 0 : index
    %4 = vector.load %arg3[%c0_3, %c0_4] : memref<2x1xf32, #tpu.memory_space<vmem>>, vector<2x1xf32>
    %c0_5 = arith.constant 0 : index
    %c0_6 = arith.constant 0 : index
    %5 = vector.load %arg5[%c0_5, %c0_6] : memref<2x512xf32, #tpu.memory_space<vmem>>, vector<2x512xf32>
    %6 = vector.broadcast %4 : vector<2x1xf32> to vector<2x512xf32>
    %7 = arith.mulf %6, %5 : vector<2x512xf32>
    %8 = arith.addf %3, %7 : vector<2x512xf32>
    %c0_7 = arith.constant 0 : index
    %c0_8 = arith.constant 0 : index
    %9 = vector.load %arg6[%c0_7, %c0_8] : memref<2x512xf32, #tpu.memory_space<vmem>>, vector<2x512xf32>
    tpu.vector_store %arg6[%c0_7, %c0_8], %8 {strides = array<i32>} : memref<2x512xf32, #tpu.memory_space<vmem>>, vector<2x512xf32>,
    return
  }
  func.func @transform_0(%arg0: i32, %arg1: i32) -> (i32, i32) {
    %c0_i32 = arith.constant 0 : i32
    %c0_i32_0 = arith.constant 0 : i32
    return %arg0, %c0_i32 : i32, i32
  }
  func.func @transform_1(%arg0: i32, %arg1: i32) -> (i32, i32) {
    %c0_i32 = arith.constant 0 : i32
    %c0_i32_0 = arith.constant 0 : i32
    return %arg0, %c0_i32 : i32, i32
  }
  func.func @transform_2(%arg0: i32, %arg1: i32) -> (i32, i32) {
    %c0_i32 = arith.constant 0 : i32
    return %arg0, %arg1 : i32, i32
  }
  func.func @transform_3(%arg0: i32, %arg1: i32) -> (i32, i32) {
    %c0_i32 = arith.constant 0 : i32
    return %arg0, %arg1 : i32, i32
  }
  func.func @transform_4(%arg0: i32, %arg1: i32) -> (i32, i32) {
    %c0_i32 = arith.constant 0 : i32
    return %arg0, %arg1 : i32, i32
  }
}

</mosaic_0001>

<bundles_post_ra>
// kernel: tpu_custom_call.1
= control target key start
LH: loop header
LB: loop body
LE: loop exit
PB: predicated region body
PF: predicated region fallthrough
CT: control target
= control target key end

     0   :  { %9 = vsyncpa [#allocation3], 0  ;;  %s963_s0 = inlined_call_operand.vmem [shape: f32[2,1], index: 0, kind: input, shape index: {}]   ;;  %s964_s1 = inlined_call_operand.vmem [shape: f32[2,1], index: 1, kind: input, shape index: {}]   ;;  %s965_s2 = inlined_call_operand.hbm [shape: f32[2,1024], index: 2, kind: input, shape index: {}]   ;;  %s966_s3 = inlined_call_operand.vmem [shape: f32[2,1024], index: 3, kind: input, shape index: {}]   ;;  %s967_s4 = inlined_call_operand.hbm [shape: f32[2,1024], index: 4, kind: output, shape index: {}]  }
   0x1   :  { %11 = vsyncpa [#allocation3 + $0x1], 0 }
   0x2   :  { %12 = vsyncpa [#allocation4], 0 }
   0x3   :  { %14 = vsyncpa [#allocation4 + $0x1], 0  ;;  %s777_s15 = smov 0   ;;  %s779_s16 = smov 0  }
   0x4   :  { %s781_s17 = smov 0   ;;  %s783_s18 = smov 0  }
   0x5   :  { %s785_s19 = smov 0   ;;  %s787_s20 = smov 0  }
   0x6 LB: > { %s546_s21 = sadd.s32 4294967295, %s746_s20   ;;  %s547_s22 = sadd.s32 4294967294, %s746_s20   ;;  %s746_s20 = sphi %s787_s20, %s20_s20   ;;  %s742_s19 = sphi %s785_s19, %s983_s19   ;;  %s738_s18 = sphi %s783_s18, %s982_s18   ;;  %s734_s17 = sphi %s781_s17, %s981_s17   ;;  %s730_s16 = sphi %s779_s16, %s980_s16   ;;  %s726_s15 = sphi %s777_s15, %s979_s15  }
   0x7   : > { %s29_s23 = sadd.s32 1, %s742_s19  ;;  %s93_s24 = sadd.s32 1, %s734_s17 }
   0x8   : > { %p30_p0 = scmp.ge.s32.totalorder %s29_s23, 2  ;;  %p100_p1 = scmp.ne.s32.totalorder %s734_s17, %s730_s16 }
   0x9   : > { %p101_p2 = scmp.eq.s32.totalorder %s746_s20, 0  ;;  %p106_p3 = scmp.ne.s32.totalorder %s730_s16, %s726_s15 }
   0xa   : > { %s985_s23 = smov (%p30_p0, %s29_s23), 0  ;;  %p107_p5 = scmp.eq.s32.totalorder %s546_s21, 0 }
   0xb   : > { %p818_p4 = por %p101_p2, %p100_p1  ;;  %s89_s26 = ssub.s32 %s742_s19, %s985_s23 }
   0xc   : > { %p160_p6 = scmp.eq.s32.totalorder %s546_s21, 1  ;;  %p91_p7 = scmp.eq.s32.totalorder %s89_s26, 0 }
   0xd   : > { %p824_p8 = por %p107_p5, %p106_p3  ;;  %p166_p10 = scmp.eq.s32.totalorder %s547_s22, 1 }
   0xe   : > { %p828_p9 = por %p160_p6, %p100_p1  ;;  %p579_p13 = scmp.lt.s32.totalorder %s746_s20, 2 }
   0xf   : > { %s833_s29 = scalar_select %p91_p7, %s734_s17, %s93_s24  }
  0x10   : > { %s971_s28 = scalar_select %p828_p9, 1, 0 }
  0x11   : > { %p835_p11 = por %p166_p10, %p106_p3  ;;  %s200_s5 = sand.u32 1, %s734_s17  }
  0x12   : > { %s552_s6 = sshll.u32 %s200_s5, 3  ;;  %s565_s7 = sshll.u32 %s742_s19, 7 }
  0x13   : > { %s972_s30 = scalar_select %p835_p11, 1, 0 }
  0x14   : > { %s846_s10 = scalar_lea.hbm %s965_s2, %s565_s7  ;;  %s204_s11 = scalar_lea.vmem [#allocation2], %s552_s6 }
  0x15   : > { %s214_s12 = sshll.u32 %s204_s11, 4  ;;  %p852_p0 = pnand %p579_p13, %p818_p4  ;;  %s848_s12 = int_to_ptr.vmem [resolvable:$true] %s214_s12 }
  0x16   : > { %s201_s14 = scalar_lea.sflag [#allocation3], %s200_s5  ;;  %s634_s21 = scalar_lea.hbm %s846_s10, 128 }
  0x17   : > { %p635_p3 = scmp.ne.s32.totalorder %s846_s10, %s634_s21  ;;  %p636_p5 = pneg %p852_p0 }
  0x18   : > { %s639_s25 = scalar_lea.hbm %s965_s2, 256  ;;  %p640_p4 = scmp.lt.u32.totalorder %s846_s10, %s965_s2 }
  0x19   : > { %p637_p6 = pnand %p636_p5, %p635_p3  ;;  %p641_p10 = scmp.lt.u32.totalorder %s639_s25, %s634_s21 }
  0x1a   : > { %p643_p12 = scmp.lt.u32.totalorder %s634_s21, %s846_s10 }
  0x1b   : > { %p638_p7 = pneg %p637_p6  ;;  %p642_p13 = por %p641_p10, %p640_p4 }
  0x1d   : > { %p644_p1 = por %p643_p12, %p642_p13 }
  0x1f   : > { %p645_p2 = pnand %p644_p1, %p638_p7 }
  0x21   : > { %648 = shalt.err (!%p645_p2)
}
  0x22   : > { %s649_s5 = scalar_lea.vmem %s848_s12, 128  ;;  %s748_s7 = smov [#allocation2]  }
  0x23   : > { %p650_p3 = scmp.ne.s32.totalorder %s848_s12, %s649_s5  ;;  %s654_s8 = sshll.u32 %s748_s7, 4  ;;  %s655_s8 = int_to_ptr.vmem [resolvable:$false] %s654_s8 }
  0x24   : > { %s656_s9 = scalar_lea.vmem %s655_s8, 256  ;;  %p657_p9 = scmp.lt.s32.totalorder %s848_s12, %s655_s8 }
  0x25   : > { %p652_p6 = pnand %p650_p3, %p636_p5  ;;  %p658_p4 = scmp.lt.s32.totalorder %s656_s9, %s649_s5 }
  0x27   : > { %p653_p11 = pneg %p652_p6  ;;  %p659_p10 = por %p658_p4, %p657_p9 }
  0x29   : > { %p660_p12 = pnand %p659_p10, %p653_p11 }
  0x2b   : > { %663 = shalt.err (!%p660_p12)
}
  0x2c   : > { %574 = dma.hbm_to_vmem [thread:$0]  (!%p852_p0), %s846_s10, 128, %s848_s12, %s201_s14  }
  0x2d   : > { %p974_p1 = scmp.lt.s32.totalorder %s746_s20, 3  ;;  %p975_p2 = scmp.ge.s32.totalorder %s746_s20, 1 }
  0x2f   : > { %p233_p5 = pnand %p975_p2, %p974_p1 }
  0x30   : > { %s888_s11 = sand.u32 (!%p233_p5), 1, %s730_s16  }
  0x31   : > { %236 = sbr.rel (%p233_p5) target bundleno = 215 (0xd7), region = 36  ;;  %s556_s21 = sshll.u32 (!%p233_p5), %s888_s11, 3 }
  0x32   : > { %s239_s22 = scalar_lea.sflag (!%p233_p5), [#allocation3], %s888_s11  ;;  %s242_s13 = scalar_lea.vmem (!%p233_p5), [#allocation2], %s556_s21 }
  0x38   : > { %717 = dma.done.wait (%p824_p8), %s239_s22, 128  }
  0x39   : > { %719 = vsyncadd (%p824_p8), %s239_s22, 4294967168  ;;  %v749_v0 = vmov 0   ;;  %v304_v1 = vld [vmem:[%s963_s0] sm:$0x3]  ;;  %s558_s25 = sshll.u32 %s738_s18, 2  ;;  %v316_v5 = vlaneseq  ;;  %s566_s7 = sshll.u32 %s738_s18, 7 }
  0x3a   : > { %631 = vset.pattern.permute.xlu0 %v749_v0  ;;  %v337_v2 = vld [vmem:[%s964_s1] sm:$0x3]  ;;  %p296_p9 = scmp.lt.s32.totalorder %s558_s25, 7  ;;  %v750_v3 = vmov 1983009808   ;;  %s283_s8 = scalar_lea.vmem [#allocation5], %s556_s21 }
  0x3b   : > { %308 = vperm.xlu0 %631, %v304_v1   ;;  %v314_v4 = vunpack.c.l.s4 %v750_v3  ;;  %v317_v7 = vshrl.u32 %v316_v5, 7  ;;  %v305_v8 = vld [vmem:[%s242_s13] sm:$0xff]  ;;  %s414_s9 = sshll.u32 %s283_s8, 4  ;;  %s914_s10 = scalar_lea.hbm %s967_s4, %s566_s7  ;;  %s916_s9 = int_to_ptr.vmem [resolvable:$true] %s414_s9 }
  0x3c   : > { %s987_s25 = smov (!%p296_p9, %s558_s25), 7  ;;  %v312_v10 = vcombine.high %v305_v8, %v305_v8  ;;  %s398_s12 = scalar_lea.sflag [#allocation4], %s888_s11 }
  0x3d   : > { %s559_s27 = sshll.u32 %s987_s25, 1  ;;  %v315_v6 = vunpack.c.0.s8 %v314_v4  ;;  %s664_s14 = scalar_lea.vmem %s916_s9, 128 }
  0x3e   : > { %s301_s5 = scalar_lea.vmem %s966_s3, %s559_s27  ;;  %p665_p8 = scmp.ne.s32.totalorder %s916_s9, %s664_s14 }
  0x3f   : > { %341 = vperm.xlu0 %631, %v337_v2   ;;  %v338_v9 = vld [vmem:[%s301_s5] sm:$0xff]  ;;  %v318_v11 = vsub.s32 %v315_v6, %v317_v7  ;;  %p976_p11 = scmp.ne.s32.totalorder %s971_s28, 0  ;;  %s751_s18 = smov [#allocation5]  }
  0x40   : > { %v345_v12 = vcombine.high %v338_v9, %v338_v9  ;;  %s668_s21 = sshll.u32 %s751_s18, 4  ;;  %s669_s21 = int_to_ptr.vmem [resolvable:$false] %s668_s21 }
  0x41   : > { %v319_v13 = vrot.slane %v305_v8, %v318_v11  ;;  %v326_v14 = vrot.slane %v312_v10, %v318_v11  ;;  %v352_v15 = vrot.slane %v338_v9, %v318_v11  ;;  %p666_p0 = pnand %p665_p8, %p976_p11  ;;  %s670_s24 = scalar_lea.vmem %s669_s21, 256 }
  0x42   : > { %v359_v16 = vrot.slane %v345_v12, %v318_v11  ;;  %p671_p13 = scmp.lt.s32.totalorder %s916_s9, %s669_s21  ;;  %p672_p3 = scmp.lt.s32.totalorder %s670_s24, %s664_s14 }
  0x43   : > { %v327_v17 = vcombine.high %v319_v13, %v319_v13  ;;  %v328_v18 = vcombine.high %v326_v14, %v326_v14  ;;  %v360_v20 = vcombine.high %v352_v15, %v352_v15  ;;  %p667_p7 = pneg %p666_p0 }
  0x44   : > { %v361_v21 = vcombine.high %v359_v16, %v359_v16  ;;  %p673_p6 = por %p672_p3, %p671_p13 }
  0x46   : > { %p674_p4 = pnand %p673_p6, %p667_p7 }
  0xba   : > { %v309_v19 = vpop.permute.xlu0 %308 }
  0xbb   : > { %v333_v22 = vmul.f32 %v319_v13, %v309_v19  ;;  %v334_v23 = vmul.f32 %v327_v17, %v309_v19  ;;  %v335_v24 = vmul.f32 %v326_v14, %v309_v19  ;;  %v336_v25 = vmul.f32 %v328_v18, %v309_v19 }
  0xbe   : > { %v342_v26 = vpop.permute.xlu0 %341 }
  0xbf   : > { %v366_v27 = vmul.f32 %v352_v15, %v342_v26  ;;  %v367_v28 = vmul.f32 %v360_v20, %v342_v26  ;;  %v368_v29 = vmul.f32 %v359_v16, %v342_v26  ;;  %v369_v30 = vmul.f32 %v361_v21, %v342_v26 }
  0xc1   : > { %v370_v31 = vadd.f32 %v366_v27, %v333_v22  ;;  %v371_v32 = vadd.f32 %v367_v28, %v334_v23  ;;  %v372_v33 = vadd.f32 %v368_v29, %v335_v24  ;;  %v373_v34 = vadd.f32 %v369_v30, %v336_v25 }
  0xc3   : > { %v378_v35 = vcombine.low %v370_v31, %v371_v32  ;;  %v379_v36 = vcombine.low %v372_v33, %v373_v34 }
  0xc5   : > { %v386_v37 = vrot.slane %v378_v35, %v318_v11  ;;  %v393_v38 = vrot.slane %v379_v36, %v318_v11 }
  0xc7   : > { %v394_v39 = vcombine.low %v386_v37, %v393_v38 }
  0xc9   : > { %396 = vst [vmem:[%s283_s8] sm:$0xff] %v394_v39 }
  0xca   : > { %677 = shalt.err (!%p674_p4)
}
  0xcb   : > { %s678_s11 = scalar_lea.hbm %s914_s10, 128  ;;  %s682_s26 = scalar_lea.hbm %s967_s4, 256 }
  0xcc   : > { %p679_p10 = scmp.ne.s32.totalorder %s914_s10, %s678_s11  ;;  %p683_p2 = scmp.lt.u32.totalorder %s914_s10, %s967_s4 }
  0xcd   : > { %p684_p5 = scmp.lt.u32.totalorder %s682_s26, %s678_s11  ;;  %p686_p8 = scmp.lt.u32.totalorder %s678_s11, %s914_s10 }
  0xce   : > { %p680_p12 = pnand %p679_p10, %p976_p11 }
  0xcf   : > { %p685_p9 = por %p684_p5, %p683_p2 }
  0xd0   : > { %p681_p1 = pneg %p680_p12 }
  0xd1   : > { %p687_p0 = por %p686_p8, %p685_p9 }
  0xd3   : > { %p688_p7 = pnand %p687_p0, %p681_p1 }
  0xd5   : > { %691 = shalt.err (!%p688_p7)
}
  0xd6   : > { %569 = dma.vmem_to_hbm [thread:$0]  (%p976_p11), %s916_s9, 128, %s914_s10, %s398_s12  }
  0xd7 PF: > { %s426_s7 = sand.u32 1, %s726_s15   ;;  %p977_p13 = scmp.ne.s32.totalorder %s972_s30, 0 }
  0xd8   : > { %p978_p3 = scmp.ge.s32.totalorder %s746_s20, 2  ;;  %s427_s8 = scalar_lea.sflag [#allocation4], %s426_s7 }
  0xda   : > { %p576_p6 = pnand %p978_p3, %p977_p13 }
  0xdc   : > { %721 = dma.done.wait (!%p576_p6), %s427_s8, 128  }
  0xdd   : > { %723 = vsyncadd (!%p576_p6), %s427_s8, 4294967168  ;;  %s20_s20 = sadd.s32 1, %s746_s20   ;;  %s979_s15 = smov %s730_s16 }
  0xde   : > { %p17_p4 = scmp.ge.s32.totalorder %s20_s20, 4   ;;  %s980_s16 = smov %s734_s17 }
  0xdf   : > { %s981_s17 = smov %s833_s29  ;;  %s982_s18 = smov %s742_s19 }
  0xe0   : > { %s983_s19 = smov %s985_s23  ;;  %19 = sbr.rel (!%p17_p4) target bundleno = 6 (0x6), region = 90 }
  0xe7   :  { %432 = vsyncpa [#allocation3], 1 }
  0xe8   :  { %434 = vsyncpa [#allocation3 + $0x1], 1 }
  0xe9   :  { %435 = vsyncpa [#allocation4], 1 }
  0xea   :  { %437 = vsyncpa [#allocation4 + $0x1], 1 }

</bundles_post_ra>
